<compile_context>
chip_gen: v5e
topology: v5e:2x2
jax: 0.10.0
libtpu: 0.0.40
codegen_flags: <defaults>
</compile_context>

<pallas_src>
import jax
import jax.numpy as jnp
from jax.experimental import pallas as pl
from jax.experimental.pallas import tpu as pltpu


_LANE = 128                      # lane width: keep last dim lane-dense
_SUBLANE = 8                     # f32 sublane granularity
_TARGET_TILE_BYTES = 2 * 1024 * 1024   # >= ~2 MiB/tile -> near HBM roofline


def _zero_const_add_kernel(zero_ref, x_ref, o_ref):
    # zero_ref: SMEM (1,) f32 scalar param; x_ref/o_ref: (TM, dim_p) VMEM tiles.
    zc = zero_ref[0]                                       # hoisted scalar read
    o_ref[...] = (x_ref[...] + zc).astype(o_ref.dtype)     # explicit downcast


def _round_up(v: int, m: int) -> int:
    return (v + m - 1) // m * m


def _choose_tile_rows(rows: int, dim_p: int, itemsize: int) -> int:
    # Aim for ~2 MiB per tile; cap at 1024 rows so 2 arrays x 2 pipeline
    # buffers stays far below the scoped-VMEM default on all generations.
    tm = _TARGET_TILE_BYTES // max(1, dim_p * itemsize)
    tm = max(_SUBLANE, min(tm, rows, 1024))
    tm = _round_up(tm, _SUBLANE)
    return min(tm, rows)


def model_apply(zero_const: jax.Array, x: jax.Array) -> jax.Array:
    """out = x + zero_const, row-tiled, lane-dense, HBM-bandwidth bound."""
    ent_num, dim = x.shape
    itemsize = jnp.dtype(x.dtype).itemsize

    dim_p = _round_up(dim, _LANE)                 # lane-dense last dim
    rows_min = _round_up(ent_num, _SUBLANE)       # sublane-aligned rows
    tm = _choose_tile_rows(rows_min, dim_p, itemsize)
    rows_p = _round_up(rows_min, tm)              # grid divides evenly

    x_p = x
    if (rows_p, dim_p) != (ent_num, dim):
        x_p = jnp.pad(x, ((0, rows_p - ent_num), (0, dim_p - dim)))

    grid = (rows_p // tm,)

    out = pl.pallas_call(
        _zero_const_add_kernel,
        out_shape=jax.ShapeDtypeStruct((rows_p, dim_p), x.dtype),
        grid=grid,
        in_specs=[
            pl.BlockSpec(memory_space=pltpu.SMEM),          # zero_const (1,)
            pl.BlockSpec((tm, dim_p), lambda i: (i, 0)),    # x row tile
        ],
        out_specs=pl.BlockSpec((tm, dim_p), lambda i: (i, 0)),
        # Output reuses x's HBM buffer (x_p is input index 1 after zero_const).
        input_output_aliases={1: 0},
        compiler_params=pltpu.CompilerParams(
            dimension_semantics=("parallel",),   # shard rows across TCs (v7x)
        ),
    )(zero_const.astype(jnp.float32), x_p)

    if (rows_p, dim_p) != (ent_num, dim):
        out = out[:ent_num, :dim]
    return out


class Model:
    """JAX counterpart of the PyTorch Model(BaseModule)."""

    def __init__(self, ent_num: int, rel_num: int):
        self.ent_num = ent_num
        self.rel_num = rel_num
        # nn.Parameter(torch.Tensor([0])), requires_grad=False
        self.zero_const = jnp.zeros((1,), dtype=jnp.float32)

    def apply_zero_const(self, x: jax.Array) -> jax.Array:
        return model_apply(self.zero_const, x)

    # forward()/predict() are abstract in the reference module.
    def forward(self):
        raise NotImplementedError

    def predict(self):
        raise NotImplementedError


if __name__ == "__main__":
    # Realistic-ish embedding shapes (non-lane-aligned dim, >1 row tile) but
    # still small: 3000 x 100 f32 ~= 1.2 MiB.
    ent_num, rel_num, dim = 3000, 4, 100
    model = Model(ent_num, rel_num)

    key = jax.random.PRNGKey(0)
    x = jax.random.normal(key, (ent_num, dim), dtype=jnp.float32)

    out = model.apply_zero_const(x)
    jax.block_until_ready(out)

    # Semantics check: zero_const == 0, so output must equal input exactly.
    assert out.shape == (ent_num, dim)
    assert bool(jnp.array_equal(out, x))

    print("KERNEL_OK")
</pallas_src>

<mosaic_0001>
module attributes {stable_mosaic.version = 11 : i64} {
  func.func @_zero_const_add_kernel(%arg0: i32, %arg1: memref<1xf32, #tpu.memory_space<smem>>, %arg2: memref<1024x128xf32, #tpu.memory_space<vmem>>, %arg3: memref<1024x128xf32, #tpu.memory_space<vmem>>) attributes {dimension_semantics = [#tpu.dimension_semantics<parallel>], iteration_bounds = array<i64: 3>, scalar_prefetch = 0 : i64, scratch_operands = 0 : i64, tpu.core_type = #tpu.core_type<tc>, window_params = [{transform_indices = @transform_0, window_bounds = array<i64: 1>}, {transform_indices = @transform_1, window_bounds = array<i64: 1024, 128>}, {transform_indices = @transform_2, window_bounds = array<i64: 1024, 128>}]} {
    %c0 = arith.constant 0 : index
    %0 = memref.load %arg1[%c0] : memref<1xf32, #tpu.memory_space<smem>>
    %c0_0 = arith.constant 0 : index
    %c0_1 = arith.constant 0 : index
    %1 = vector.load %arg2[%c0_0, %c0_1] : memref<1024x128xf32, #tpu.memory_space<vmem>>, vector<1024x128xf32>
    %2 = vector.broadcast %0 : f32 to vector<1024x128xf32>
    %3 = arith.addf %1, %2 : vector<1024x128xf32>
    %c0_2 = arith.constant 0 : index
    %c0_3 = arith.constant 0 : index
    %4 = vector.load %arg3[%c0_2, %c0_3] : memref<1024x128xf32, #tpu.memory_space<vmem>>, vector<1024x128xf32>
    tpu.vector_store %arg3[%c0_2, %c0_3], %3 {strides = array<i32>} : memref<1024x128xf32, #tpu.memory_space<vmem>>, vector<1024x128xf32>,
    return
  }
  func.func @transform_0(%arg0: i32) -> i32 {
    %c0_i32 = arith.constant 0 : i32
    %c0_i32_0 = arith.constant 0 : i32
    return %c0_i32 : i32
  }
  func.func @transform_1(%arg0: i32) -> (i32, i32) {
    %c0_i32 = arith.constant 0 : i32
    %c0_i32_0 = arith.constant 0 : i32
    return %arg0, %c0_i32 : i32, i32
  }
  func.func @transform_2(%arg0: i32) -> (i32, i32) {
    %c0_i32 = arith.constant 0 : i32
    %c0_i32_0 = arith.constant 0 : i32
    return %arg0, %c0_i32 : i32, i32
  }
}

</mosaic_0001>

<bundles_post_ra>
// kernel: tpu_custom_call.1
= control target key start
LH: loop header
LB: loop body
LE: loop exit
PB: predicated region body
PF: predicated region fallthrough
CT: control target
= control target key end

     0   :  { %s1344_s0 = inlined_call_operand.<no memory space> [shape: f32[1], index: 0, kind: input, shape index: {}]   ;;  %s1345_s1 = inlined_call_operand.hbm [shape: f32[3072,128], index: 1, kind: input, shape index: {}, may-alias: {1,2}]   ;;  %s1346_s2 = inlined_call_operand.hbm [shape: f32[3072,128], index: 2, kind: output, shape index: {}, may-alias: {1,2}]  }
   0x1   :  { %7 = sst [smem:[#allocation2]] %s1344_s0 }
   0x2   :  { %8 = vsyncpa [#allocation4], 0 }
   0x3   :  { %10 = vsyncpa [#allocation4 + $0x1], 0 }
   0x4   :  { %11 = vsyncpa [#allocation5], 0 }
   0x5   :  { %13 = vsyncpa [#allocation5 + $0x1], 0  ;;  %s828_s11 = smov 0   ;;  %s830_s12 = smov 0  }
   0x6   :  { %s832_s13 = smov 0   ;;  %s834_s14 = smov 0  }
   0x7 LB: > { %s849_s0 = sadd.s32 4294967295, %s804_s14   ;;  %s642_s15 = sadd.s32 4294967294, %s804_s14   ;;  %s804_s14 = sphi %s834_s14, %s1355_s14   ;;  %s800_s13 = sphi %s832_s13, %s1354_s13   ;;  %s796_s12 = sphi %s830_s12, %s1353_s12   ;;  %s792_s11 = sphi %s828_s11, %s1352_s11  }
   0x8   : > { %s853_s16 = sadd.s32 1, %s804_s14   ;;  %s47_s17 = sadd.s32 1, %s800_s13 }
   0x9   : > { %s44_s18 = ssub.s32 %s804_s14, %s853_s16  ;;  %p54_p0 = scmp.ne.s32.totalorder %s800_s13, %s796_s12 }
   0xa   : > { %p45_p1 = scmp.eq.s32.totalorder %s44_s18, 0  ;;  %p55_p2 = scmp.eq.s32.totalorder %s804_s14, 0 }
   0xb   : > { %p60_p3 = scmp.ne.s32.totalorder %s796_s12, %s792_s11  ;;  %p61_p4 = scmp.eq.s32.totalorder %s849_s0, 0 }
   0xc   : > { %s865_s19 = scalar_select %p45_p1, %s800_s13, %s47_s17  }
   0xd   : > { %p867_p5 = por %p55_p2, %p54_p0  ;;  %p871_p6 = por %p61_p4, %p60_p3 }
   0xe   : > { %p84_p7 = scmp.eq.s32.totalorder %s849_s0, 2  ;;  %p90_p8 = scmp.eq.s32.totalorder %s642_s15, 2 }
   0xf   : > { %p670_p9 = scmp.lt.s32.totalorder %s804_s14, 3  ;;  %s113_s24 = sand.u32 1, %s800_s13  }
  0x10   : > { %p877_p10 = por %p84_p7, %p54_p0  ;;  %p881_p11 = por %p90_p8, %p60_p3 }
  0x11   : > { %s656_s25 = sshll.u32 %s804_s14, 10  ;;  %s645_s26 = sshll.u32 %s113_s24, 10 }
  0x12   : > { %s122_s29 = scalar_lea.hbm %s1345_s1, %s656_s25  ;;  %s117_s3 = scalar_lea.vmem [#allocation3], %s645_s26 }
  0x13   : > { %s123_s30 = sshll.u32 %s122_s29, 4  ;;  %s125_s4 = sshll.u32 %s117_s3, 4  ;;  %s124_s30 = int_to_ptr.hbm [resolvable:$true] %s123_s30  ;;  %s126_s4 = int_to_ptr.vmem [resolvable:$true] %s125_s4 }
  0x14   : > { %p892_p12 = pnand %p670_p9, %p867_p5  ;;  %p648_p13 = scmp.ge.s32.totalorder %s804_s14, 1 }
  0x15   : > { %p133_p0 = scmp.lt.s32.totalorder %s804_s14, 4  ;;  %s114_s6 = scalar_lea.sflag [#allocation4], %s113_s24 }
  0x16   : > { %s708_s7 = sshra.s32 %s124_s30, 4  ;;  %p712_p2 = pneg %p892_p12  ;;  %s709_s7 = int_to_ptr.hbm [resolvable:$true] %s708_s7 }
  0x17   : > { %s710_s8 = scalar_lea.hbm %s709_s7, 1024  ;;  %s715_s15 = scalar_lea.hbm %s1345_s1, 3072 }
  0x18   : > { %p711_p1 = scmp.ne.s32.totalorder %s709_s7, %s710_s8  ;;  %p716_p5 = scmp.lt.s32.totalorder %s709_s7, %s1345_s1 }
  0x19   : > { %p717_p7 = scmp.lt.s32.totalorder %s715_s15, %s710_s8 }
  0x1a   : > { %p713_p3 = pnand %p712_p2, %p711_p1 }
  0x1b   : > { %p718_p8 = por %p717_p7, %p716_p5 }
  0x1c   : > { %p714_p4 = pneg %p713_p3 }
  0x1e   : > { %p719_p9 = pnand %p718_p8, %p714_p4 }
  0x20   : > { %722 = shalt.err (!%p719_p9)
}
  0x21   : > { %s806_s20 = smov 128   ;;  %s807_s24 = smov 8  }
  0x22   : > { %665 = dma.hbm_to_vmem [thread:$0]  (!%p892_p12), %s124_s30, 16384, %s126_s4, %s114_s6, %s806_s20, %s806_s20, %s807_s24  }
  0x23   : > { %p134_p1 = pnand %p648_p13, %p133_p0 }
  0x24   : > { %s913_s25 = sand.u32 (!%p134_p1), 1, %s796_s12  }
  0x25   : > { %137 = sbr.rel (%p134_p1) target bundleno = 183 (0xb7), region = 28  ;;  %s649_s26 = sshll.u32 (!%p134_p1), %s913_s25, 10 }
  0x26   : > { %s140_s27 = scalar_lea.sflag (!%p134_p1), [#allocation4], %s913_s25  ;;  %s917_s28 = scalar_lea.vmem (!%p134_p1), [#allocation3], %s649_s26 }
  0x2a   : > { %783 = dma.done.wait (%p871_p6), %s140_s27, 16384  }
  0x2b   : > { %785 = vsyncadd (%p871_p6), %s140_s27, 4294950912  ;;  %s167_s29 = sld [smem:[#allocation2]]  ;;  %v168_v0 = vld [vmem:[%s917_s28] sm:$0xff]  ;;  %v169_v2 = vld [vmem:[%s917_s28 + $0x8] sm:$0xff]  ;;  %s936_s21 = scalar_lea.vmem [#allocation6], %s649_s26 }
  0x2c   : > { %v170_v3 = vld [vmem:[%s917_s28 + $0x10] sm:$0xff]  ;;  %v171_v7 = vld [vmem:[%s917_s28 + $0x18] sm:$0xff]  ;;  %v172_v8 = vld [vmem:[%s917_s28 + $0x20] sm:$0xff]  ;;  %s657_s30 = sshll.u32 %s849_s0, 10  ;;  %s566_s5 = sshll.u32 %s936_s21, 4  ;;  %s567_s5 = int_to_ptr.vmem [resolvable:$true] %s566_s5 }
  0x2d   : > { %v173_v9 = vld [vmem:[%s917_s28 + $0x28] sm:$0xff]  ;;  %v174_v11 = vld [vmem:[%s917_s28 + $0x30] sm:$0xff]  ;;  %v175_v13 = vld [vmem:[%s917_s28 + $0x38] sm:$0xff]  ;;  %s565_s0 = scalar_lea.hbm %s1346_s2, %s657_s30  ;;  %s554_s7 = scalar_lea.sflag [#allocation5], %s913_s25 }
  0x2e   : > { %v176_v15 = vld [vmem:[%s917_s28 + $0x40] sm:$0xff]  ;;  %v177_v17 = vld [vmem:[%s917_s28 + $0x48] sm:$0xff]  ;;  %v178_v19 = vld [vmem:[%s917_s28 + $0x50] sm:$0xff]  ;;  %s568_s6 = sshll.u32 %s565_s0, 4  ;;  %s758_s17 = scalar_lea.hbm %s1346_s2, 3072  ;;  %s569_s6 = int_to_ptr.hbm [resolvable:$true] %s568_s6 }
  0x2f   : > { %v179_v21 = vld [vmem:[%s917_s28 + $0x58] sm:$0xff]  ;;  %v180_v23 = vld [vmem:[%s917_s28 + $0x60] sm:$0xff]  ;;  %v181_v25 = vld [vmem:[%s917_s28 + $0x68] sm:$0xff]  ;;  %s752_s8 = sshra.s32 %s569_s6, 4  ;;  %s753_s8 = int_to_ptr.hbm [resolvable:$true] %s752_s8 }
  0x30   : > { %v182_v27 = vld [vmem:[%s917_s28 + $0x70] sm:$0xff]  ;;  %v183_v29 = vld [vmem:[%s917_s28 + $0x78] sm:$0xff]  ;;  %v184_v31 = vld [vmem:[%s917_s28 + $0x80] sm:$0xff]  ;;  %s754_s9 = scalar_lea.hbm %s753_s8, 1024  ;;  %p759_p0 = scmp.lt.s32.totalorder %s753_s8, %s1346_s2 }
  0x31   : > { %v924_v1 = vstv %s167_s29  ;;  %v185_v33 = vld [vmem:[%s917_s28 + $0x88] sm:$0xff]  ;;  %v186_v35 = vld [vmem:[%s917_s28 + $0x90] sm:$0xff]  ;;  %v187_v37 = vld [vmem:[%s917_s28 + $0x98] sm:$0xff]  ;;  %p755_p6 = scmp.ne.s32.totalorder %s753_s8, %s754_s9  ;;  %p760_p2 = scmp.lt.s32.totalorder %s758_s17, %s754_s9 }
  0x32   : > { %v297_v4 = vadd.f32 %v924_v1, %v168_v0  ;;  %v298_v5 = vadd.f32 %v924_v1, %v169_v2  ;;  %v299_v6 = vadd.f32 %v924_v1, %v170_v3  ;;  %v300_v10 = vadd.f32 %v924_v1, %v171_v7  ;;  %v188_v39 = vld [vmem:[%s917_s28 + $0xa0] sm:$0xff]  ;;  %v189_v41 = vld [vmem:[%s917_s28 + $0xa8] sm:$0xff]  ;;  %v190_v43 = vld [vmem:[%s917_s28 + $0xb0] sm:$0xff] }
  0x33   : > { %v301_v12 = vadd.f32 %v924_v1, %v172_v8  ;;  %v302_v14 = vadd.f32 %v924_v1, %v173_v9  ;;  %v303_v16 = vadd.f32 %v924_v1, %v174_v11  ;;  %v304_v18 = vadd.f32 %v924_v1, %v175_v13  ;;  %v191_v45 = vld [vmem:[%s917_s28 + $0xb8] sm:$0xff]  ;;  %v192_v47 = vld [vmem:[%s917_s28 + $0xc0] sm:$0xff]  ;;  %v193_v49 = vld [vmem:[%s917_s28 + $0xc8] sm:$0xff]  ;;  %p756_p12 = pnand %p755_p6, %p877_p10  ;;  %p761_p3 = por %p760_p2, %p759_p0 }
  0x34   : > { %425 = vst [vmem:[%s936_s21] sm:$0xff] %v297_v4  ;;  %v305_v20 = vadd.f32 %v924_v1, %v176_v15  ;;  %v306_v22 = vadd.f32 %v924_v1, %v177_v17  ;;  %v307_v24 = vadd.f32 %v924_v1, %v178_v19  ;;  %v308_v26 = vadd.f32 %v924_v1, %v179_v21  ;;  %v194_v51 = vld [vmem:[%s917_s28 + $0xd0] sm:$0xff]  ;;  %v195_v53 = vld [vmem:[%s917_s28 + $0xd8] sm:$0xff]  ;;  %v196_v55 = vld [vmem:[%s917_s28 + $0xe0] sm:$0xff] }
  0x35   : > { %426 = vst [vmem:[%s936_s21 + $0x8] sm:$0xff] %v298_v5  ;;  %v309_v28 = vadd.f32 %v924_v1, %v180_v23  ;;  %v310_v30 = vadd.f32 %v924_v1, %v181_v25  ;;  %v311_v32 = vadd.f32 %v924_v1, %v182_v27  ;;  %v312_v34 = vadd.f32 %v924_v1, %v183_v29  ;;  %v197_v57 = vld [vmem:[%s917_s28 + $0xe8] sm:$0xff]  ;;  %v198_v59 = vld [vmem:[%s917_s28 + $0xf0] sm:$0xff]  ;;  %v199_v61 = vld [vmem:[%s917_s28 + $0xf8] sm:$0xff]  ;;  %p757_p13 = pneg %p756_p12 }
  0x36   : > { %427 = vst [vmem:[%s936_s21 + $0x10] sm:$0xff] %v299_v6  ;;  %v313_v36 = vadd.f32 %v924_v1, %v184_v31  ;;  %v314_v38 = vadd.f32 %v924_v1, %v185_v33  ;;  %v315_v40 = vadd.f32 %v924_v1, %v186_v35  ;;  %v316_v42 = vadd.f32 %v924_v1, %v187_v37  ;;  %v200_v63 = vld [vmem:[%s917_s28 + $0x100] sm:$0xff]  ;;  %v201_v2 = vld [vmem:[%s917_s28 + $0x108] sm:$0xff]  ;;  %v202_v4 = vld [vmem:[%s917_s28 + $0x110] sm:$0xff] }
  0x37   : > { %428 = vst [vmem:[%s936_s21 + $0x18] sm:$0xff] %v300_v10  ;;  %v317_v44 = vadd.f32 %v924_v1, %v188_v39  ;;  %v318_v46 = vadd.f32 %v924_v1, %v189_v41  ;;  %v319_v48 = vadd.f32 %v924_v1, %v190_v43  ;;  %v320_v50 = vadd.f32 %v924_v1, %v191_v45  ;;  %v203_v6 = vld [vmem:[%s917_s28 + $0x118] sm:$0xff]  ;;  %v204_v8 = vld [vmem:[%s917_s28 + $0x120] sm:$0xff]  ;;  %v205_v10 = vld [vmem:[%s917_s28 + $0x128] sm:$0xff]  ;;  %p762_p4 = pnand %p761_p3, %p757_p13 }
  0x38   : > { %429 = vst [vmem:[%s936_s21 + $0x20] sm:$0xff] %v301_v12  ;;  %v321_v52 = vadd.f32 %v924_v1, %v192_v47  ;;  %v322_v54 = vadd.f32 %v924_v1, %v193_v49  ;;  %v323_v56 = vadd.f32 %v924_v1, %v194_v51  ;;  %v324_v58 = vadd.f32 %v924_v1, %v195_v53  ;;  %v206_v12 = vld [vmem:[%s917_s28 + $0x130] sm:$0xff] }
  0x39   : > { %430 = vst [vmem:[%s936_s21 + $0x28] sm:$0xff] %v302_v14  ;;  %v325_v60 = vadd.f32 %v924_v1, %v196_v55  ;;  %v326_v62 = vadd.f32 %v924_v1, %v197_v57  ;;  %v327_v0 = vadd.f32 %v924_v1, %v198_v59  ;;  %v328_v3 = vadd.f32 %v924_v1, %v199_v61  ;;  %v207_v14 = vld [vmem:[%s917_s28 + $0x138] sm:$0xff] }
  0x3a   : > { %431 = vst [vmem:[%s936_s21 + $0x30] sm:$0xff] %v303_v16  ;;  %v329_v5 = vadd.f32 %v924_v1, %v200_v63  ;;  %v330_v7 = vadd.f32 %v924_v1, %v201_v2  ;;  %v331_v9 = vadd.f32 %v924_v1, %v202_v4  ;;  %v332_v11 = vadd.f32 %v924_v1, %v203_v6  ;;  %v208_v16 = vld [vmem:[%s917_s28 + $0x140] sm:$0xff] }
  0x3b   : > { %432 = vst [vmem:[%s936_s21 + $0x38] sm:$0xff] %v304_v18  ;;  %v333_v13 = vadd.f32 %v924_v1, %v204_v8  ;;  %v334_v15 = vadd.f32 %v924_v1, %v205_v10  ;;  %v335_v17 = vadd.f32 %v924_v1, %v206_v12  ;;  %v209_v18 = vld [vmem:[%s917_s28 + $0x148] sm:$0xff]  ;;  %v336_v19 = vadd.f32 %v924_v1, %v207_v14 }
  0x3c   : > { %433 = vst [vmem:[%s936_s21 + $0x40] sm:$0xff] %v305_v20  ;;  %v210_v20 = vld [vmem:[%s917_s28 + $0x150] sm:$0xff]  ;;  %v337_v21 = vadd.f32 %v924_v1, %v208_v16  ;;  %v338_v23 = vadd.f32 %v924_v1, %v209_v18 }
  0x3d   : > { %434 = vst [vmem:[%s936_s21 + $0x48] sm:$0xff] %v306_v22  ;;  %v211_v22 = vld [vmem:[%s917_s28 + $0x158] sm:$0xff]  ;;  %v339_v25 = vadd.f32 %v924_v1, %v210_v20 }
  0x3e   : > { %435 = vst [vmem:[%s936_s21 + $0x50] sm:$0xff] %v307_v24  ;;  %v212_v24 = vld [vmem:[%s917_s28 + $0x160] sm:$0xff]  ;;  %v340_v27 = vadd.f32 %v924_v1, %v211_v22 }
  0x3f   : > { %436 = vst [vmem:[%s936_s21 + $0x58] sm:$0xff] %v308_v26  ;;  %v213_v26 = vld [vmem:[%s917_s28 + $0x168] sm:$0xff]  ;;  %v341_v29 = vadd.f32 %v924_v1, %v212_v24 }
  0x40   : > { %437 = vst [vmem:[%s936_s21 + $0x60] sm:$0xff] %v309_v28  ;;  %v214_v28 = vld [vmem:[%s917_s28 + $0x170] sm:$0xff]  ;;  %v342_v31 = vadd.f32 %v924_v1, %v213_v26 }
  0x41   : > { %438 = vst [vmem:[%s936_s21 + $0x68] sm:$0xff] %v310_v30  ;;  %v215_v30 = vld [vmem:[%s917_s28 + $0x178] sm:$0xff]  ;;  %v343_v33 = vadd.f32 %v924_v1, %v214_v28 }
  0x42   : > { %439 = vst [vmem:[%s936_s21 + $0x70] sm:$0xff] %v311_v32  ;;  %v216_v32 = vld [vmem:[%s917_s28 + $0x180] sm:$0xff]  ;;  %v344_v35 = vadd.f32 %v924_v1, %v215_v30 }
  0x43   : > { %440 = vst [vmem:[%s936_s21 + $0x78] sm:$0xff] %v312_v34  ;;  %v217_v34 = vld [vmem:[%s917_s28 + $0x188] sm:$0xff]  ;;  %v345_v37 = vadd.f32 %v924_v1, %v216_v32 }
  0x44   : > { %441 = vst [vmem:[%s936_s21 + $0x80] sm:$0xff] %v313_v36  ;;  %v218_v36 = vld [vmem:[%s917_s28 + $0x190] sm:$0xff]  ;;  %v346_v39 = vadd.f32 %v924_v1, %v217_v34 }
  0x45   : > { %442 = vst [vmem:[%s936_s21 + $0x88] sm:$0xff] %v314_v38  ;;  %v219_v38 = vld [vmem:[%s917_s28 + $0x198] sm:$0xff]  ;;  %v347_v41 = vadd.f32 %v924_v1, %v218_v36 }
  0x46   : > { %443 = vst [vmem:[%s936_s21 + $0x90] sm:$0xff] %v315_v40  ;;  %v220_v40 = vld [vmem:[%s917_s28 + $0x1a0] sm:$0xff]  ;;  %v348_v43 = vadd.f32 %v924_v1, %v219_v38 }
  0x47   : > { %444 = vst [vmem:[%s936_s21 + $0x98] sm:$0xff] %v316_v42  ;;  %v221_v42 = vld [vmem:[%s917_s28 + $0x1a8] sm:$0xff]  ;;  %v349_v45 = vadd.f32 %v924_v1, %v220_v40 }
  0x48   : > { %445 = vst [vmem:[%s936_s21 + $0xa0] sm:$0xff] %v317_v44  ;;  %v222_v44 = vld [vmem:[%s917_s28 + $0x1b0] sm:$0xff]  ;;  %v350_v47 = vadd.f32 %v924_v1, %v221_v42 }
  0x49   : > { %446 = vst [vmem:[%s936_s21 + $0xa8] sm:$0xff] %v318_v46  ;;  %v223_v46 = vld [vmem:[%s917_s28 + $0x1b8] sm:$0xff]  ;;  %v351_v49 = vadd.f32 %v924_v1, %v222_v44 }
  0x4a   : > { %447 = vst [vmem:[%s936_s21 + $0xb0] sm:$0xff] %v319_v48  ;;  %v224_v48 = vld [vmem:[%s917_s28 + $0x1c0] sm:$0xff]  ;;  %v352_v51 = vadd.f32 %v924_v1, %v223_v46 }
  0x4b   : > { %448 = vst [vmem:[%s936_s21 + $0xb8] sm:$0xff] %v320_v50  ;;  %v225_v50 = vld [vmem:[%s917_s28 + $0x1c8] sm:$0xff]  ;;  %v353_v53 = vadd.f32 %v924_v1, %v224_v48 }
  0x4c   : > { %449 = vst [vmem:[%s936_s21 + $0xc0] sm:$0xff] %v321_v52  ;;  %v226_v52 = vld [vmem:[%s917_s28 + $0x1d0] sm:$0xff]  ;;  %v354_v55 = vadd.f32 %v924_v1, %v225_v50 }
  0x4d   : > { %450 = vst [vmem:[%s936_s21 + $0xc8] sm:$0xff] %v322_v54  ;;  %v227_v54 = vld [vmem:[%s917_s28 + $0x1d8] sm:$0xff]  ;;  %v355_v57 = vadd.f32 %v924_v1, %v226_v52 }
  0x4e   : > { %451 = vst [vmem:[%s936_s21 + $0xd0] sm:$0xff] %v323_v56  ;;  %v228_v56 = vld [vmem:[%s917_s28 + $0x1e0] sm:$0xff]  ;;  %v356_v59 = vadd.f32 %v924_v1, %v227_v54 }
  0x4f   : > { %452 = vst [vmem:[%s936_s21 + $0xd8] sm:$0xff] %v324_v58  ;;  %v229_v58 = vld [vmem:[%s917_s28 + $0x1e8] sm:$0xff]  ;;  %v357_v61 = vadd.f32 %v924_v1, %v228_v56 }
  0x50   : > { %453 = vst [vmem:[%s936_s21 + $0xe0] sm:$0xff] %v325_v60  ;;  %v230_v60 = vld [vmem:[%s917_s28 + $0x1f0] sm:$0xff]  ;;  %v358_v63 = vadd.f32 %v924_v1, %v229_v58 }
  0x51   : > { %454 = vst [vmem:[%s936_s21 + $0xe8] sm:$0xff] %v326_v62  ;;  %v231_v62 = vld [vmem:[%s917_s28 + $0x1f8] sm:$0xff]  ;;  %v359_v2 = vadd.f32 %v924_v1, %v230_v60 }
  0x52   : > { %455 = vst [vmem:[%s936_s21 + $0xf0] sm:$0xff] %v327_v0  ;;  %v232_v0 = vld [vmem:[%s917_s28 + $0x200] sm:$0xff]  ;;  %v360_v4 = vadd.f32 %v924_v1, %v231_v62 }
  0x53   : > { %456 = vst [vmem:[%s936_s21 + $0xf8] sm:$0xff] %v328_v3  ;;  %v233_v3 = vld [vmem:[%s917_s28 + $0x208] sm:$0xff]  ;;  %v361_v6 = vadd.f32 %v924_v1, %v232_v0 }
  0x54   : > { %457 = vst [vmem:[%s936_s21 + $0x100] sm:$0xff] %v329_v5  ;;  %v234_v5 = vld [vmem:[%s917_s28 + $0x210] sm:$0xff]  ;;  %v362_v8 = vadd.f32 %v924_v1, %v233_v3 }
  0x55   : > { %458 = vst [vmem:[%s936_s21 + $0x108] sm:$0xff] %v330_v7  ;;  %v235_v7 = vld [vmem:[%s917_s28 + $0x218] sm:$0xff]  ;;  %v363_v10 = vadd.f32 %v924_v1, %v234_v5 }
  0x56   : > { %459 = vst [vmem:[%s936_s21 + $0x110] sm:$0xff] %v331_v9  ;;  %v236_v9 = vld [vmem:[%s917_s28 + $0x220] sm:$0xff]  ;;  %v364_v12 = vadd.f32 %v924_v1, %v235_v7 }
  0x57   : > { %460 = vst [vmem:[%s936_s21 + $0x118] sm:$0xff] %v332_v11  ;;  %v237_v11 = vld [vmem:[%s917_s28 + $0x228] sm:$0xff]  ;;  %v365_v14 = vadd.f32 %v924_v1, %v236_v9 }
  0x58   : > { %461 = vst [vmem:[%s936_s21 + $0x120] sm:$0xff] %v333_v13  ;;  %v238_v13 = vld [vmem:[%s917_s28 + $0x230] sm:$0xff]  ;;  %v366_v16 = vadd.f32 %v924_v1, %v237_v11 }
  0x59   : > { %462 = vst [vmem:[%s936_s21 + $0x128] sm:$0xff] %v334_v15  ;;  %v239_v15 = vld [vmem:[%s917_s28 + $0x238] sm:$0xff]  ;;  %v367_v18 = vadd.f32 %v924_v1, %v238_v13 }
  0x5a   : > { %463 = vst [vmem:[%s936_s21 + $0x130] sm:$0xff] %v335_v17  ;;  %v240_v17 = vld [vmem:[%s917_s28 + $0x240] sm:$0xff]  ;;  %v368_v20 = vadd.f32 %v924_v1, %v239_v15 }
  0x5b   : > { %464 = vst [vmem:[%s936_s21 + $0x138] sm:$0xff] %v336_v19  ;;  %v241_v19 = vld [vmem:[%s917_s28 + $0x248] sm:$0xff]  ;;  %v369_v22 = vadd.f32 %v924_v1, %v240_v17 }
  0x5c   : > { %465 = vst [vmem:[%s936_s21 + $0x140] sm:$0xff] %v337_v21  ;;  %v242_v21 = vld [vmem:[%s917_s28 + $0x250] sm:$0xff]  ;;  %v370_v24 = vadd.f32 %v924_v1, %v241_v19 }
  0x5d   : > { %466 = vst [vmem:[%s936_s21 + $0x148] sm:$0xff] %v338_v23  ;;  %v243_v23 = vld [vmem:[%s917_s28 + $0x258] sm:$0xff]  ;;  %v371_v26 = vadd.f32 %v924_v1, %v242_v21 }
  0x5e   : > { %467 = vst [vmem:[%s936_s21 + $0x150] sm:$0xff] %v339_v25  ;;  %v244_v25 = vld [vmem:[%s917_s28 + $0x260] sm:$0xff]  ;;  %v372_v28 = vadd.f32 %v924_v1, %v243_v23 }
  0x5f   : > { %468 = vst [vmem:[%s936_s21 + $0x158] sm:$0xff] %v340_v27  ;;  %v245_v27 = vld [vmem:[%s917_s28 + $0x268] sm:$0xff]  ;;  %v373_v30 = vadd.f32 %v924_v1, %v244_v25 }
  0x60   : > { %469 = vst [vmem:[%s936_s21 + $0x160] sm:$0xff] %v341_v29  ;;  %v246_v29 = vld [vmem:[%s917_s28 + $0x270] sm:$0xff]  ;;  %v374_v32 = vadd.f32 %v924_v1, %v245_v27 }
  0x61   : > { %470 = vst [vmem:[%s936_s21 + $0x168] sm:$0xff] %v342_v31  ;;  %v247_v31 = vld [vmem:[%s917_s28 + $0x278] sm:$0xff]  ;;  %v375_v34 = vadd.f32 %v924_v1, %v246_v29 }
  0x62   : > { %471 = vst [vmem:[%s936_s21 + $0x170] sm:$0xff] %v343_v33  ;;  %v248_v33 = vld [vmem:[%s917_s28 + $0x280] sm:$0xff]  ;;  %v376_v36 = vadd.f32 %v924_v1, %v247_v31 }
  0x63   : > { %472 = vst [vmem:[%s936_s21 + $0x178] sm:$0xff] %v344_v35  ;;  %v249_v35 = vld [vmem:[%s917_s28 + $0x288] sm:$0xff]  ;;  %v377_v38 = vadd.f32 %v924_v1, %v248_v33 }
  0x64   : > { %473 = vst [vmem:[%s936_s21 + $0x180] sm:$0xff] %v345_v37  ;;  %v250_v37 = vld [vmem:[%s917_s28 + $0x290] sm:$0xff]  ;;  %v378_v40 = vadd.f32 %v924_v1, %v249_v35 }
  0x65   : > { %474 = vst [vmem:[%s936_s21 + $0x188] sm:$0xff] %v346_v39  ;;  %v251_v39 = vld [vmem:[%s917_s28 + $0x298] sm:$0xff]  ;;  %v379_v42 = vadd.f32 %v924_v1, %v250_v37 }
  0x66   : > { %475 = vst [vmem:[%s936_s21 + $0x190] sm:$0xff] %v347_v41  ;;  %v252_v41 = vld [vmem:[%s917_s28 + $0x2a0] sm:$0xff]  ;;  %v380_v44 = vadd.f32 %v924_v1, %v251_v39 }
  0x67   : > { %476 = vst [vmem:[%s936_s21 + $0x198] sm:$0xff] %v348_v43  ;;  %v253_v43 = vld [vmem:[%s917_s28 + $0x2a8] sm:$0xff]  ;;  %v381_v46 = vadd.f32 %v924_v1, %v252_v41 }
  0x68   : > { %477 = vst [vmem:[%s936_s21 + $0x1a0] sm:$0xff] %v349_v45  ;;  %v254_v45 = vld [vmem:[%s917_s28 + $0x2b0] sm:$0xff]  ;;  %v382_v48 = vadd.f32 %v924_v1, %v253_v43 }
  0x69   : > { %478 = vst [vmem:[%s936_s21 + $0x1a8] sm:$0xff] %v350_v47  ;;  %v255_v47 = vld [vmem:[%s917_s28 + $0x2b8] sm:$0xff]  ;;  %v383_v50 = vadd.f32 %v924_v1, %v254_v45 }
  0x6a   : > { %479 = vst [vmem:[%s936_s21 + $0x1b0] sm:$0xff] %v351_v49  ;;  %v256_v49 = vld [vmem:[%s917_s28 + $0x2c0] sm:$0xff]  ;;  %v384_v52 = vadd.f32 %v924_v1, %v255_v47 }
  0x6b   : > { %480 = vst [vmem:[%s936_s21 + $0x1b8] sm:$0xff] %v352_v51  ;;  %v257_v51 = vld [vmem:[%s917_s28 + $0x2c8] sm:$0xff]  ;;  %v385_v54 = vadd.f32 %v924_v1, %v256_v49 }
  0x6c   : > { %481 = vst [vmem:[%s936_s21 + $0x1c0] sm:$0xff] %v353_v53  ;;  %v258_v53 = vld [vmem:[%s917_s28 + $0x2d0] sm:$0xff]  ;;  %v386_v56 = vadd.f32 %v924_v1, %v257_v51 }
  0x6d   : > { %482 = vst [vmem:[%s936_s21 + $0x1c8] sm:$0xff] %v354_v55  ;;  %v259_v55 = vld [vmem:[%s917_s28 + $0x2d8] sm:$0xff]  ;;  %v387_v58 = vadd.f32 %v924_v1, %v258_v53 }
  0x6e   : > { %483 = vst [vmem:[%s936_s21 + $0x1d0] sm:$0xff] %v355_v57  ;;  %v260_v57 = vld [vmem:[%s917_s28 + $0x2e0] sm:$0xff]  ;;  %v388_v60 = vadd.f32 %v924_v1, %v259_v55 }
  0x6f   : > { %484 = vst [vmem:[%s936_s21 + $0x1d8] sm:$0xff] %v356_v59  ;;  %v261_v59 = vld [vmem:[%s917_s28 + $0x2e8] sm:$0xff]  ;;  %v389_v62 = vadd.f32 %v924_v1, %v260_v57 }
  0x70   : > { %485 = vst [vmem:[%s936_s21 + $0x1e0] sm:$0xff] %v357_v61  ;;  %v262_v61 = vld [vmem:[%s917_s28 + $0x2f0] sm:$0xff]  ;;  %v390_v0 = vadd.f32 %v924_v1, %v261_v59 }
  0x71   : > { %486 = vst [vmem:[%s936_s21 + $0x1e8] sm:$0xff] %v358_v63  ;;  %v263_v63 = vld [vmem:[%s917_s28 + $0x2f8] sm:$0xff]  ;;  %v391_v3 = vadd.f32 %v924_v1, %v262_v61 }
  0x72   : > { %487 = vst [vmem:[%s936_s21 + $0x1f0] sm:$0xff] %v359_v2  ;;  %v264_v2 = vld [vmem:[%s917_s28 + $0x300] sm:$0xff]  ;;  %v392_v5 = vadd.f32 %v924_v1, %v263_v63 }
  0x73   : > { %488 = vst [vmem:[%s936_s21 + $0x1f8] sm:$0xff] %v360_v4  ;;  %v265_v4 = vld [vmem:[%s917_s28 + $0x308] sm:$0xff]  ;;  %v393_v7 = vadd.f32 %v924_v1, %v264_v2 }
  0x74   : > { %489 = vst [vmem:[%s936_s21 + $0x200] sm:$0xff] %v361_v6  ;;  %v266_v6 = vld [vmem:[%s917_s28 + $0x310] sm:$0xff]  ;;  %v394_v9 = vadd.f32 %v924_v1, %v265_v4 }
  0x75   : > { %490 = vst [vmem:[%s936_s21 + $0x208] sm:$0xff] %v362_v8  ;;  %v267_v8 = vld [vmem:[%s917_s28 + $0x318] sm:$0xff]  ;;  %v395_v11 = vadd.f32 %v924_v1, %v266_v6 }
  0x76   : > { %491 = vst [vmem:[%s936_s21 + $0x210] sm:$0xff] %v363_v10  ;;  %v268_v10 = vld [vmem:[%s917_s28 + $0x320] sm:$0xff]  ;;  %v396_v13 = vadd.f32 %v924_v1, %v267_v8 }
  0x77   : > { %492 = vst [vmem:[%s936_s21 + $0x218] sm:$0xff] %v364_v12  ;;  %v269_v12 = vld [vmem:[%s917_s28 + $0x328] sm:$0xff]  ;;  %v397_v15 = vadd.f32 %v924_v1, %v268_v10 }
  0x78   : > { %493 = vst [vmem:[%s936_s21 + $0x220] sm:$0xff] %v365_v14  ;;  %v270_v14 = vld [vmem:[%s917_s28 + $0x330] sm:$0xff]  ;;  %v398_v17 = vadd.f32 %v924_v1, %v269_v12 }
  0x79   : > { %494 = vst [vmem:[%s936_s21 + $0x228] sm:$0xff] %v366_v16  ;;  %v271_v16 = vld [vmem:[%s917_s28 + $0x338] sm:$0xff]  ;;  %v399_v19 = vadd.f32 %v924_v1, %v270_v14 }
  0x7a   : > { %495 = vst [vmem:[%s936_s21 + $0x230] sm:$0xff] %v367_v18  ;;  %v272_v18 = vld [vmem:[%s917_s28 + $0x340] sm:$0xff]  ;;  %v400_v21 = vadd.f32 %v924_v1, %v271_v16 }
  0x7b   : > { %496 = vst [vmem:[%s936_s21 + $0x238] sm:$0xff] %v368_v20  ;;  %v273_v20 = vld [vmem:[%s917_s28 + $0x348] sm:$0xff]  ;;  %v401_v23 = vadd.f32 %v924_v1, %v272_v18 }
  0x7c   : > { %497 = vst [vmem:[%s936_s21 + $0x240] sm:$0xff] %v369_v22  ;;  %v274_v22 = vld [vmem:[%s917_s28 + $0x350] sm:$0xff]  ;;  %v402_v25 = vadd.f32 %v924_v1, %v273_v20 }
  0x7d   : > { %498 = vst [vmem:[%s936_s21 + $0x248] sm:$0xff] %v370_v24  ;;  %v275_v24 = vld [vmem:[%s917_s28 + $0x358] sm:$0xff]  ;;  %v403_v27 = vadd.f32 %v924_v1, %v274_v22 }
  0x7e   : > { %499 = vst [vmem:[%s936_s21 + $0x250] sm:$0xff] %v371_v26  ;;  %v276_v26 = vld [vmem:[%s917_s28 + $0x360] sm:$0xff]  ;;  %v404_v29 = vadd.f32 %v924_v1, %v275_v24 }
  0x7f   : > { %500 = vst [vmem:[%s936_s21 + $0x258] sm:$0xff] %v372_v28  ;;  %v277_v28 = vld [vmem:[%s917_s28 + $0x368] sm:$0xff]  ;;  %v405_v31 = vadd.f32 %v924_v1, %v276_v26 }
  0x80   : > { %501 = vst [vmem:[%s936_s21 + $0x260] sm:$0xff] %v373_v30  ;;  %v278_v30 = vld [vmem:[%s917_s28 + $0x370] sm:$0xff]  ;;  %v406_v33 = vadd.f32 %v924_v1, %v277_v28 }
  0x81   : > { %502 = vst [vmem:[%s936_s21 + $0x268] sm:$0xff] %v374_v32  ;;  %v279_v32 = vld [vmem:[%s917_s28 + $0x378] sm:$0xff]  ;;  %v407_v35 = vadd.f32 %v924_v1, %v278_v30 }
  0x82   : > { %503 = vst [vmem:[%s936_s21 + $0x270] sm:$0xff] %v375_v34  ;;  %v280_v34 = vld [vmem:[%s917_s28 + $0x380] sm:$0xff]  ;;  %v408_v37 = vadd.f32 %v924_v1, %v279_v32 }
  0x83   : > { %504 = vst [vmem:[%s936_s21 + $0x278] sm:$0xff] %v376_v36  ;;  %v281_v36 = vld [vmem:[%s917_s28 + $0x388] sm:$0xff]  ;;  %v409_v39 = vadd.f32 %v924_v1, %v280_v34 }
  0x84   : > { %505 = vst [vmem:[%s936_s21 + $0x280] sm:$0xff] %v377_v38  ;;  %v282_v38 = vld [vmem:[%s917_s28 + $0x390] sm:$0xff]  ;;  %v410_v41 = vadd.f32 %v924_v1, %v281_v36 }
  0x85   : > { %506 = vst [vmem:[%s936_s21 + $0x288] sm:$0xff] %v378_v40  ;;  %v283_v40 = vld [vmem:[%s917_s28 + $0x398] sm:$0xff]  ;;  %v411_v43 = vadd.f32 %v924_v1, %v282_v38 }
  0x86   : > { %507 = vst [vmem:[%s936_s21 + $0x290] sm:$0xff] %v379_v42  ;;  %v284_v42 = vld [vmem:[%s917_s28 + $0x3a0] sm:$0xff]  ;;  %v412_v45 = vadd.f32 %v924_v1, %v283_v40 }
  0x87   : > { %508 = vst [vmem:[%s936_s21 + $0x298] sm:$0xff] %v380_v44  ;;  %v285_v44 = vld [vmem:[%s917_s28 + $0x3a8] sm:$0xff]  ;;  %v413_v47 = vadd.f32 %v924_v1, %v284_v42 }
  0x88   : > { %509 = vst [vmem:[%s936_s21 + $0x2a0] sm:$0xff] %v381_v46  ;;  %v286_v46 = vld [vmem:[%s917_s28 + $0x3b0] sm:$0xff]  ;;  %v414_v49 = vadd.f32 %v924_v1, %v285_v44 }
  0x89   : > { %510 = vst [vmem:[%s936_s21 + $0x2a8] sm:$0xff] %v382_v48  ;;  %v287_v48 = vld [vmem:[%s917_s28 + $0x3b8] sm:$0xff]  ;;  %v415_v51 = vadd.f32 %v924_v1, %v286_v46 }
  0x8a   : > { %511 = vst [vmem:[%s936_s21 + $0x2b0] sm:$0xff] %v383_v50  ;;  %v288_v50 = vld [vmem:[%s917_s28 + $0x3c0] sm:$0xff]  ;;  %v416_v53 = vadd.f32 %v924_v1, %v287_v48 }
  0x8b   : > { %512 = vst [vmem:[%s936_s21 + $0x2b8] sm:$0xff] %v384_v52  ;;  %v289_v52 = vld [vmem:[%s917_s28 + $0x3c8] sm:$0xff]  ;;  %v417_v55 = vadd.f32 %v924_v1, %v288_v50 }
  0x8c   : > { %513 = vst [vmem:[%s936_s21 + $0x2c0] sm:$0xff] %v385_v54  ;;  %v290_v54 = vld [vmem:[%s917_s28 + $0x3d0] sm:$0xff]  ;;  %v418_v57 = vadd.f32 %v924_v1, %v289_v52 }
  0x8d   : > { %514 = vst [vmem:[%s936_s21 + $0x2c8] sm:$0xff] %v386_v56  ;;  %v291_v56 = vld [vmem:[%s917_s28 + $0x3d8] sm:$0xff]  ;;  %v419_v59 = vadd.f32 %v924_v1, %v290_v54 }
  0x8e   : > { %515 = vst [vmem:[%s936_s21 + $0x2d0] sm:$0xff] %v387_v58  ;;  %v292_v58 = vld [vmem:[%s917_s28 + $0x3e0] sm:$0xff]  ;;  %v420_v61 = vadd.f32 %v924_v1, %v291_v56 }
  0x8f   : > { %516 = vst [vmem:[%s936_s21 + $0x2d8] sm:$0xff] %v388_v60  ;;  %v293_v60 = vld [vmem:[%s917_s28 + $0x3e8] sm:$0xff]  ;;  %v421_v63 = vadd.f32 %v924_v1, %v292_v58 }
  0x90   : > { %517 = vst [vmem:[%s936_s21 + $0x2e0] sm:$0xff] %v389_v62  ;;  %v294_v62 = vld [vmem:[%s917_s28 + $0x3f0] sm:$0xff]  ;;  %v422_v2 = vadd.f32 %v924_v1, %v293_v60 }
  0x91   : > { %518 = vst [vmem:[%s936_s21 + $0x2e8] sm:$0xff] %v390_v0  ;;  %v295_v0 = vld [vmem:[%s917_s28 + $0x3f8] sm:$0xff] }
  0x92   : > { %519 = vst [vmem:[%s936_s21 + $0x2f0] sm:$0xff] %v391_v3  ;;  %v423_v3 = vadd.f32 %v924_v1, %v294_v62  ;;  %v424_v4 = vadd.f32 %v924_v1, %v295_v0 }
  0x93   : > { %520 = vst [vmem:[%s936_s21 + $0x2f8] sm:$0xff] %v392_v5 }
  0x94   : > { %521 = vst [vmem:[%s936_s21 + $0x300] sm:$0xff] %v393_v7 }
  0x95   : > { %522 = vst [vmem:[%s936_s21 + $0x308] sm:$0xff] %v394_v9 }
  0x96   : > { %523 = vst [vmem:[%s936_s21 + $0x310] sm:$0xff] %v395_v11 }
  0x97   : > { %524 = vst [vmem:[%s936_s21 + $0x318] sm:$0xff] %v396_v13 }
  0x98   : > { %525 = vst [vmem:[%s936_s21 + $0x320] sm:$0xff] %v397_v15 }
  0x99   : > { %526 = vst [vmem:[%s936_s21 + $0x328] sm:$0xff] %v398_v17 }
  0x9a   : > { %527 = vst [vmem:[%s936_s21 + $0x330] sm:$0xff] %v399_v19 }
  0x9b   : > { %528 = vst [vmem:[%s936_s21 + $0x338] sm:$0xff] %v400_v21 }
  0x9c   : > { %529 = vst [vmem:[%s936_s21 + $0x340] sm:$0xff] %v401_v23 }
  0x9d   : > { %530 = vst [vmem:[%s936_s21 + $0x348] sm:$0xff] %v402_v25 }
  0x9e   : > { %531 = vst [vmem:[%s936_s21 + $0x350] sm:$0xff] %v403_v27 }
  0x9f   : > { %532 = vst [vmem:[%s936_s21 + $0x358] sm:$0xff] %v404_v29 }
  0xa0   : > { %533 = vst [vmem:[%s936_s21 + $0x360] sm:$0xff] %v405_v31 }
  0xa1   : > { %534 = vst [vmem:[%s936_s21 + $0x368] sm:$0xff] %v406_v33 }
  0xa2   : > { %535 = vst [vmem:[%s936_s21 + $0x370] sm:$0xff] %v407_v35 }
  0xa3   : > { %536 = vst [vmem:[%s936_s21 + $0x378] sm:$0xff] %v408_v37 }
  0xa4   : > { %537 = vst [vmem:[%s936_s21 + $0x380] sm:$0xff] %v409_v39 }
  0xa5   : > { %538 = vst [vmem:[%s936_s21 + $0x388] sm:$0xff] %v410_v41 }
  0xa6   : > { %539 = vst [vmem:[%s936_s21 + $0x390] sm:$0xff] %v411_v43 }
  0xa7   : > { %540 = vst [vmem:[%s936_s21 + $0x398] sm:$0xff] %v412_v45 }
  0xa8   : > { %541 = vst [vmem:[%s936_s21 + $0x3a0] sm:$0xff] %v413_v47 }
  0xa9   : > { %542 = vst [vmem:[%s936_s21 + $0x3a8] sm:$0xff] %v414_v49 }
  0xaa   : > { %543 = vst [vmem:[%s936_s21 + $0x3b0] sm:$0xff] %v415_v51 }
  0xab   : > { %544 = vst [vmem:[%s936_s21 + $0x3b8] sm:$0xff] %v416_v53 }
  0xac   : > { %545 = vst [vmem:[%s936_s21 + $0x3c0] sm:$0xff] %v417_v55 }
  0xad   : > { %546 = vst [vmem:[%s936_s21 + $0x3c8] sm:$0xff] %v418_v57 }
  0xae   : > { %547 = vst [vmem:[%s936_s21 + $0x3d0] sm:$0xff] %v419_v59 }
  0xaf   : > { %548 = vst [vmem:[%s936_s21 + $0x3d8] sm:$0xff] %v420_v61 }
  0xb0   : > { %549 = vst [vmem:[%s936_s21 + $0x3e0] sm:$0xff] %v421_v63 }
  0xb1   : > { %550 = vst [vmem:[%s936_s21 + $0x3e8] sm:$0xff] %v422_v2 }
  0xb2   : > { %551 = vst [vmem:[%s936_s21 + $0x3f0] sm:$0xff] %v423_v3 }
  0xb3   : > { %552 = vst [vmem:[%s936_s21 + $0x3f8] sm:$0xff] %v424_v4 }
  0xb4   : > { %765 = shalt.err (!%p762_p4)
}
  0xb5   : > { %s808_s24 = smov 128   ;;  %s809_s25 = smov 8  }
  0xb6   : > { %660 = dma.vmem_to_hbm [thread:$0]  (%p877_p10), %s567_s5, 16384, %s569_s6, %s554_s7, %s808_s24, %s808_s24, %s809_s25  }
  0xb7 PF: > { %p671_p5 = scmp.ge.s32.totalorder %s804_s14, 2  ;;  %s583_s26 = sand.u32 1, %s792_s11  }
  0xb8   : > { %s584_s27 = scalar_lea.sflag [#allocation5], %s583_s26 }
  0xb9   : > { %p667_p7 = pnand %p671_p5, %p881_p11 }
  0xbb   : > { %p668_p8 = pneg %p667_p7 }
  0xbd   : > { %787 = dma.done.wait (%p668_p8), %s584_s27, 16384  }
  0xbe   : > { %789 = vsyncadd (%p668_p8), %s584_s27, 4294950912  ;;  %p16_p9 = scmp.ge.s32.totalorder %s853_s16, 5   ;;  %s1352_s11 = smov %s796_s12 }
  0xbf   : > { %s1353_s12 = smov %s800_s13  ;;  %s1354_s13 = smov %s865_s19 }
  0xc0   : > { %s1355_s14 = smov %s853_s16  ;;  %18 = sbr.rel (!%p16_p9) target bundleno = 7 (0x7), region = 73 }
  0xc5   :  { %590 = vsyncpa [#allocation4], 1 }
  0xc6   :  { %592 = vsyncpa [#allocation4 + $0x1], 1 }
  0xc7   :  { %593 = vsyncpa [#allocation5], 1 }
  0xc8   :  { %595 = vsyncpa [#allocation5 + $0x1], 1 }

</bundles_post_ra>
